<compile_context>
chip_gen: v7x
topology: tpu7x:2x2x1
jax: 0.10.0
libtpu: 0.0.40
codegen_flags: <defaults>
</compile_context>

<pallas_src>
import jax
import jax.numpy as jnp
from jax.experimental import pallas as pl
from jax.experimental.pallas import tpu as pltpu

LANE = 128


def _round_up(n, m):
    return ((n + m - 1) // m) * m


def _cdiv(a, b):
    return (a + b - 1) // b


def mlp_kernel(x_ref, w1_ref, b1_ref, w2_ref, b2_ref, o_ref):
    # x arrives as f32; cast to bf16 in VMEM (VPU op, hidden under the MXU)
    # so both matmuls take the native bf16 MXU path with f32 accumulation.
    x = x_ref[...].astype(jnp.bfloat16)
    h = jnp.dot(x, w1_ref[...], preferred_element_type=jnp.float32)
    h = jnp.maximum(h + b1_ref[...], 0.0)
    out = jnp.dot(h.astype(w2_ref.dtype), w2_ref[...],
                  preferred_element_type=jnp.float32)
    o_ref[...] = (out + b2_ref[...]).astype(o_ref.dtype)


def pack_params(w1, b1, w2, b2):
    """Pad only the *output* feature dims to lane multiples and cast to bf16.

    w1: (in, hidden)  b1: (1, hidden)  w2: (hidden, classes)  b2: (1, classes)
    (weights stored transposed vs. PyTorch, i.e. (in_features, out_features)).
    The contraction dim (784) is left unpadded; zero-padding of hidden/class
    columns is exact and sliced off in the wrapper.
    """
    in_f, hid = w1.shape
    ncls = w2.shape[1]
    hid_p = _round_up(hid, LANE)
    out_p = _round_up(ncls, LANE)
    w1p = jnp.zeros((in_f, hid_p), jnp.bfloat16).at[:, :hid].set(
        w1.astype(jnp.bfloat16))
    b1p = jnp.zeros((1, hid_p), jnp.float32).at[:, :hid].set(b1)
    w2p = jnp.zeros((hid_p, out_p), jnp.bfloat16).at[:hid, :ncls].set(
        w2.astype(jnp.bfloat16))
    b2p = jnp.zeros((1, out_p), jnp.float32).at[:, :ncls].set(b2)
    return w1p, b1p, w2p, b2p


def neural_net_forward(x, w1p, b1p, w2p, b2p, num_classes, *, tile_batch=512):
    """x: (B, input_size) f32; packed bf16 weights -> (B, num_classes) f32."""
    B, in_f = x.shape
    assert w1p.shape[0] == in_f
    hid_p = w1p.shape[1]
    out_p = w2p.shape[1]

    if B < 128:
        # Serving path: whole (16-aligned) batch in one step.
        tb = _round_up(B, 16)
    else:
        # Large tiles to amortize per-step overhead, but keep >= 2 grid steps
        # once there are >= 2 lane-sized row blocks so both v7x TensorCores
        # receive work through the "parallel" batch axis.
        nblk = _cdiv(B, LANE)
        tb = LANE * min(tile_batch // LANE, max(1, nblk // 2))
    bp = _round_up(B, tb)

    # Pad only the batch dim; keep f32 (kernel casts to bf16 in VMEM).
    xp = x if bp == B else jnp.pad(x, ((0, bp - B), (0, 0)))

    out = pl.pallas_call(
        mlp_kernel,
        out_shape=jax.ShapeDtypeStruct((bp, out_p), jnp.float32),
        grid=(bp // tb,),
        in_specs=[
            # x: tiled over batch; K dim is the full 784 (full-extent block).
            pl.BlockSpec((tb, in_f), lambda i: (i, 0)),
            # Weights/biases: constant block (0,0) -> VMEM-resident, single
            # buffer (no pointless double-buffering).
            pl.BlockSpec((in_f, hid_p), lambda i: (0, 0),
                         pipeline_mode=pl.Buffered(1)),
            pl.BlockSpec((1, hid_p), lambda i: (0, 0),
                         pipeline_mode=pl.Buffered(1)),
            pl.BlockSpec((hid_p, out_p), lambda i: (0, 0),
                         pipeline_mode=pl.Buffered(1)),
            pl.BlockSpec((1, out_p), lambda i: (0, 0),
                         pipeline_mode=pl.Buffered(1)),
        ],
        out_specs=pl.BlockSpec((tb, out_p), lambda i: (i, 0)),
        compiler_params=pltpu.CompilerParams(
            dimension_semantics=("parallel",)),
    )(xp, w1p, b1p, w2p, b2p)

    # Padded batch rows / padded class columns are garbage/zero by design;
    # never consume the padded buffer directly.
    return out[:B, :num_classes]


def init_params(key, input_size=784, hidden_size=500, num_classes=10):
    """Deterministic init mirroring nn.Linear's uniform(-1/sqrt(fan_in), ...).
    Returns f32 weights stored as (in_features, out_features) == PyTorch W.T."""
    k1, k2, k3, k4 = jax.random.split(key, 4)
    bound1 = 1.0 / jnp.sqrt(float(input_size))
    bound2 = 1.0 / jnp.sqrt(float(hidden_size))
    w1 = jax.random.uniform(k1, (input_size, hidden_size), jnp.float32,
                            minval=-bound1, maxval=bound1)
    b1 = jax.random.uniform(k2, (1, hidden_size), jnp.float32,
                            minval=-bound1, maxval=bound1)
    w2 = jax.random.uniform(k3, (hidden_size, num_classes), jnp.float32,
                            minval=-bound2, maxval=bound2)
    b2 = jax.random.uniform(k4, (1, num_classes), jnp.float32,
                            minval=-bound2, maxval=bound2)
    return w1, b1, w2, b2


if __name__ == "__main__":
    input_size, hidden_size, num_classes = 784, 500, 10
    batch = 8

    key = jax.random.PRNGKey(0)
    kx, kp = jax.random.split(key)
    x = jax.random.normal(kx, (batch, input_size), jnp.float32)
    w1, b1, w2, b2 = init_params(kp, input_size, hidden_size, num_classes)

    # Pack once (serving-style: weights stay padded/bf16 across calls).
    w1p, b1p, w2p, b2p = pack_params(w1, b1, w2, b2)

    out = neural_net_forward(x, w1p, b1p, w2p, b2p, num_classes)
    out = jax.block_until_ready(out)

    # Reference in plain f32 JAX (same math as the PyTorch module).
    ref = jnp.maximum(x @ w1 + b1, 0.0) @ w2 + b2
    assert out.shape == (batch, num_classes)
    # bf16 weights + bf16 x / hidden activations with f32 accumulate.
    assert jnp.allclose(out, ref, atol=3e-2, rtol=3e-2)

    print("KERNEL_OK")
</pallas_src>

<mosaic_0001>
module attributes {stable_mosaic.version = 11 : i64} {
  func.func @mlp_kernel(%arg0: i32, %arg1: memref<16x784xf32, #tpu.memory_space<vmem>>, %arg2: memref<784x512xbf16, #tpu.memory_space<vmem>>, %arg3: memref<1x512xf32, #tpu.memory_space<vmem>>, %arg4: memref<512x128xbf16, #tpu.memory_space<vmem>>, %arg5: memref<1x128xf32, #tpu.memory_space<vmem>>, %arg6: memref<16x128xf32, #tpu.memory_space<vmem>>) attributes {dimension_semantics = [#tpu.dimension_semantics<parallel>], iteration_bounds = array<i64: 1>, scalar_prefetch = 0 : i64, scratch_operands = 0 : i64, tpu.core_type = #tpu.core_type<tc>, window_params = [{transform_indices = @transform_0, window_bounds = array<i64: 16, 784>}, {pipeline_mode = #tpu.pipeline_mode<synchronous>, transform_indices = @transform_1, window_bounds = array<i64: 784, 512>}, {pipeline_mode = #tpu.pipeline_mode<synchronous>, transform_indices = @transform_2, window_bounds = array<i64: 1, 512>}, {pipeline_mode = #tpu.pipeline_mode<synchronous>, transform_indices = @transform_3, window_bounds = array<i64: 512, 128>}, {pipeline_mode = #tpu.pipeline_mode<synchronous>, transform_indices = @transform_4, window_bounds = array<i64: 1, 128>}, {transform_indices = @transform_5, window_bounds = array<i64: 16, 128>}]} {
    %c0 = arith.constant 0 : index
    %c0_0 = arith.constant 0 : index
    %0 = vector.load %arg1[%c0, %c0_0] : memref<16x784xf32, #tpu.memory_space<vmem>>, vector<16x784xf32>
    %1 = arith.truncf %0 : vector<16x784xf32> to vector<16x784xbf16>
    %c0_1 = arith.constant 0 : index
    %c0_2 = arith.constant 0 : index
    %2 = vector.load %arg2[%c0_1, %c0_2] : memref<784x512xbf16, #tpu.memory_space<vmem>>, vector<784x512xbf16>
    %cst = arith.constant dense<0.000000e+00> : vector<16x512xf32>
    %3 = tpu.matmul %1, %2, %cst {dimension_numbers = #tpu.dot_dimension_numbers<[1], [0], [0], [1], [0, 0, 1, 1], [], []>} : vector<16x784xbf16>, vector<784x512xbf16>, vector<16x512xf32> -> vector<16x512xf32>
    %c0_3 = arith.constant 0 : index
    %c0_4 = arith.constant 0 : index
    %4 = vector.load %arg3[%c0_3, %c0_4] : memref<1x512xf32, #tpu.memory_space<vmem>>, vector<1x512xf32>
    %5 = vector.broadcast %4 : vector<1x512xf32> to vector<16x512xf32>
    %6 = arith.addf %3, %5 : vector<16x512xf32>
    %cst_5 = arith.constant 0.000000e+00 : f32
    %7 = vector.broadcast %cst_5 : f32 to vector<16x512xf32>
    %8 = arith.maximumf %6, %7 : vector<16x512xf32>
    %9 = arith.truncf %8 : vector<16x512xf32> to vector<16x512xbf16>
    %c0_6 = arith.constant 0 : index
    %c0_7 = arith.constant 0 : index
    %10 = vector.load %arg4[%c0_6, %c0_7] : memref<512x128xbf16, #tpu.memory_space<vmem>>, vector<512x128xbf16>
    %cst_8 = arith.constant dense<0.000000e+00> : vector<16x128xf32>
    %11 = tpu.matmul %9, %10, %cst_8 {dimension_numbers = #tpu.dot_dimension_numbers<[1], [0], [0], [1], [0, 0, 1, 1], [], []>} : vector<16x512xbf16>, vector<512x128xbf16>, vector<16x128xf32> -> vector<16x128xf32>
    %c0_9 = arith.constant 0 : index
    %c0_10 = arith.constant 0 : index
    %12 = vector.load %arg5[%c0_9, %c0_10] : memref<1x128xf32, #tpu.memory_space<vmem>>, vector<1x128xf32>
    %13 = vector.broadcast %12 : vector<1x128xf32> to vector<16x128xf32>
    %14 = arith.addf %11, %13 : vector<16x128xf32>
    %c0_11 = arith.constant 0 : index
    %c0_12 = arith.constant 0 : index
    %15 = vector.load %arg6[%c0_11, %c0_12] : memref<16x128xf32, #tpu.memory_space<vmem>>, vector<16x128xf32>
    tpu.vector_store %arg6[%c0_11, %c0_12], %14 {strides = array<i32>} : memref<16x128xf32, #tpu.memory_space<vmem>>, vector<16x128xf32>,
    return
  }
  func.func @transform_0(%arg0: i32) -> (i32, i32) {
    %c0_i32 = arith.constant 0 : i32
    %c0_i32_0 = arith.constant 0 : i32
    return %arg0, %c0_i32 : i32, i32
  }
  func.func @transform_1(%arg0: i32) -> (i32, i32) {
    %c0_i32 = arith.constant 0 : i32
    %c0_i32_0 = arith.constant 0 : i32
    %c0_i32_1 = arith.constant 0 : i32
    return %c0_i32, %c0_i32_0 : i32, i32
  }
  func.func @transform_2(%arg0: i32) -> (i32, i32) {
    %c0_i32 = arith.constant 0 : i32
    %c0_i32_0 = arith.constant 0 : i32
    %c0_i32_1 = arith.constant 0 : i32
    return %c0_i32, %c0_i32_0 : i32, i32
  }
  func.func @transform_3(%arg0: i32) -> (i32, i32) {
    %c0_i32 = arith.constant 0 : i32
    %c0_i32_0 = arith.constant 0 : i32
    %c0_i32_1 = arith.constant 0 : i32
    return %c0_i32, %c0_i32_0 : i32, i32
  }
  func.func @transform_4(%arg0: i32) -> (i32, i32) {
    %c0_i32 = arith.constant 0 : i32
    %c0_i32_0 = arith.constant 0 : i32
    %c0_i32_1 = arith.constant 0 : i32
    return %c0_i32, %c0_i32_0 : i32, i32
  }
  func.func @transform_5(%arg0: i32) -> (i32, i32) {
    %c0_i32 = arith.constant 0 : i32
    %c0_i32_0 = arith.constant 0 : i32
    return %arg0, %c0_i32 : i32, i32
  }
}

</mosaic_0001>

<bundles_post_ra>
// kernel: tpu_custom_call.1
= control target key start
LH: loop header
LB: loop body
LE: loop exit
PB: predicated region body
PF: predicated region fallthrough
CT: control target
= control target key end

     0   :  { %10 = vsyncpa [#allocation3], 0  ;;  %s2844_s0 = inlined_call_operand.hbm [shape: f32[16,784], index: 0, kind: input, shape index: {}]   ;;  %s2845_s1 = inlined_call_operand.hbm [shape: bf16[784,512], index: 1, kind: input, shape index: {}]   ;;  %s2846_s2 = inlined_call_operand.vmem [shape: f32[1,512], index: 2, kind: input, shape index: {}]   ;;  %s2847_s3 = inlined_call_operand.hbm [shape: bf16[512,128], index: 3, kind: input, shape index: {}]   ;;  %s2848_s4 = inlined_call_operand.vmem [shape: f32[1,128], index: 4, kind: input, shape index: {}]   ;;  %s2849_s5 = inlined_call_operand.hbm [shape: f32[16,128], index: 5, kind: output, shape index: {}]  }
   0x1   :  { %11 = vsyncpa [#allocation6], 0 }
   0x2   :  { %12 = vsyncpa [#allocation4], 0  ;;  %s2747_s18 = smov [#allocation5]   ;;  %s2653_s22 = scalar_lea.hbm %s2845_s1, 25088 }
   0x3   :  { %s30_s19 = sshll.u32 %s2747_s18, 4  ;;  %p2654_p0 = scmp.ne.s32.totalorder %s2845_s1, %s2653_s22  ;;  %s31_s19 = int_to_ptr.vmem [resolvable:$true] %s30_s19 }
   0x4   :  { %p2657_p1 = scmp.lt.u32.totalorder %s2653_s22, %s2845_s1 }
   0x6   :  { %p2659_p2 = pnand %p2657_p1, %p2654_p0 }
   0x8   :  { %2662 = shalt.err (!%p2659_p2)
}
   0x9   :  { %s2663_s27 = scalar_lea.vmem %s31_s19, 25088  ;;  %p2668_p4 = scmp.lt.s32.totalorder %s31_s19, %s31_s19 }
   0xa   :  { %p2664_p3 = scmp.ne.s32.totalorder %s31_s19, %s2663_s27  ;;  %p2669_p5 = scmp.lt.s32.totalorder %s2663_s27, %s2663_s27 }
   0xc   :  { %p2670_p6 = por %p2669_p5, %p2668_p4 }
   0xe   :  { %p2671_p7 = pnand %p2670_p6, %p2664_p3 }
  0x10   :  { %2674 = shalt.err (!%p2671_p7)
}
  0x11   :  { %s2748_s28 = smov 256   ;;  %s2749_s29 = smov 16  }
  0x12   :  { %36 = dma.hbm_to_vmem [thread:$0]  %s2845_s1, 25088, %s31_s19, [#allocation6], %s2748_s28, %s2748_s28, %s2749_s29  }
  0x13   :  { %s2750_s7 = smov [#allocation2]   ;;  %s2675_s11 = scalar_lea.hbm %s2844_s0, 1792 }
  0x14   :  { %s18_s8 = sshll.u32 %s2750_s7, 4  ;;  %p2676_p8 = scmp.ne.s32.totalorder %s2844_s0, %s2675_s11  ;;  %s19_s8 = int_to_ptr.vmem [resolvable:$true] %s18_s8 }
  0x15   :  { %p2679_p9 = scmp.lt.u32.totalorder %s2675_s11, %s2844_s0 }
  0x17   :  { %p2681_p10 = pnand %p2679_p9, %p2676_p8 }
  0x19   :  { %2684 = shalt.err (!%p2681_p10)
}
  0x1a   :  { %s2685_s16 = scalar_lea.vmem %s19_s8, 1792  ;;  %p2690_p12 = scmp.lt.s32.totalorder %s19_s8, %s19_s8 }
  0x1b   :  { %p2686_p11 = scmp.ne.s32.totalorder %s19_s8, %s2685_s16  ;;  %p2691_p13 = scmp.lt.s32.totalorder %s2685_s16, %s2685_s16 }
  0x1d   :  { %p2692_p0 = por %p2691_p13, %p2690_p12 }
  0x1f   :  { %p2693_p1 = pnand %p2692_p0, %p2686_p11 }
  0x21   :  { %2696 = shalt.err (!%p2693_p1)
}
  0x22   :  { %s2751_s1 = smov 896   ;;  %s2752_s17 = smov 56  }
  0x23   :  { %24 = dma.hbm_to_vmem [thread:$0]  %s2844_s0, 1792, %s19_s8, [#allocation3], %s2751_s1, %s2751_s1, %s2752_s17  }
  0x24   :  { %s2753_s20 = smov [#allocation7]   ;;  %s2697_s24 = scalar_lea.hbm %s2847_s3, 4096 }
  0x25   :  { %s44_s21 = sshll.u32 %s2753_s20, 4  ;;  %p2698_p2 = scmp.ne.s32.totalorder %s2847_s3, %s2697_s24  ;;  %s45_s21 = int_to_ptr.vmem [resolvable:$true] %s44_s21 }
  0x26   :  { %p2701_p3 = scmp.lt.u32.totalorder %s2697_s24, %s2847_s3 }
  0x28   :  { %p2703_p4 = pnand %p2701_p3, %p2698_p2 }
  0x2a   :  { %2706 = shalt.err (!%p2703_p4)
}
  0x2b   :  { %s2707_s29 = scalar_lea.vmem %s45_s21, 4096  ;;  %p2712_p6 = scmp.lt.s32.totalorder %s45_s21, %s45_s21 }
  0x2c   :  { %p2708_p5 = scmp.ne.s32.totalorder %s45_s21, %s2707_s29  ;;  %p2713_p7 = scmp.lt.s32.totalorder %s2707_s29, %s2707_s29 }
  0x2e   :  { %p2714_p8 = por %p2713_p7, %p2712_p6 }
  0x30   :  { %p2715_p9 = pnand %p2714_p8, %p2708_p5 }
  0x32   :  { %2718 = shalt.err (!%p2715_p9)
}
  0x33   :  { %s2754_s0 = smov 64   ;;  %s2755_s30 = smov 4  }
  0x34   :  { %50 = dma.hbm_to_vmem [thread:$0]  %s2847_s3, 4096, %s45_s21, [#allocation6], %s2754_s0, %s2754_s0, %s2755_s30  }
  0x35   :  { %2741 = dma.done.wait [#allocation3], 1792  }
  0x36   :  { %2742 = vsyncadd [#allocation3], 4294965504 }
  0x37   :  { %2743 = dma.done.wait [#allocation6], 29184  }
  0x38   :  { %2744 = vsyncadd [#allocation6], 4294938112  ;;  %v2327_v0 = vld [vmem:[#allocation5 + $0x4] ss:$16 sps:$4 sm:$0xff]   ;;  %v2329_v1 = vld [vmem:[#allocation5 + $0xc] ss:$16 sps:$4 sm:$0xff]  }
  0x39   :  { %1286 = vmatprep.subr.bf16.mxu0 %v2327_v0  ;;  %v2331_v2 = vld [vmem:[#allocation5] ss:$16 sps:$4 sm:$0xff]   ;;  %v2332_v3 = vld [vmem:[#allocation5 + $0x8] ss:$16 sps:$4 sm:$0xff]   ;;  %1458 = vmatprep.subr.bf16.mxu1 %v2329_v1  ;;  %v2333_v4 = vld [vmem:[#allocation5 + $0x24] ss:$16 sps:$4 sm:$0xff]  }
  0x3a   :  { %1287 = vmatpush1.bf16.msra.mxu0 %v2331_v2  ;;  %1459 = vmatpush1.bf16.msra.mxu1 %v2332_v3  ;;  %v2335_v5 = vld [vmem:[#allocation5 + $0x2c] ss:$16 sps:$4 sm:$0xff]   ;;  %v2337_v6 = vld [vmem:[#allocation5 + $0x20] ss:$16 sps:$4 sm:$0xff]   ;;  %v2338_v7 = vld [vmem:[#allocation5 + $0x28] ss:$16 sps:$4 sm:$0xff]  }
  0x3b   :  { %1288 = vmatprep.subr.bf16.mxu0 %v2333_v4  ;;  %1460 = vmatprep.subr.bf16.mxu1 %v2335_v5  ;;  %v2339_v8 = vld [vmem:[#allocation5 + $0x44] ss:$16 sps:$4 sm:$0xff]   ;;  %v2341_v9 = vld [vmem:[#allocation5 + $0x4c] ss:$16 sps:$4 sm:$0xff]   ;;  %v2343_v10 = vld [vmem:[#allocation5 + $0x40] ss:$16 sps:$4 sm:$0xff]  }
  0x3c   :  { %v2344_v11 = vld [vmem:[#allocation5 + $0x48] ss:$16 sps:$4 sm:$0xff]   ;;  %v2345_v12 = vld [vmem:[#allocation5 + $0x64] ss:$16 sps:$4 sm:$0xff]   ;;  %v2347_v13 = vld [vmem:[#allocation5 + $0x6c] ss:$16 sps:$4 sm:$0xff]  }
  0x3d   :  { %v2349_v14 = vld [vmem:[#allocation5 + $0x60] ss:$16 sps:$4 sm:$0xff]   ;;  %v2350_v15 = vld [vmem:[#allocation5 + $0x68] ss:$16 sps:$4 sm:$0xff]   ;;  %v2351_v16 = vld [vmem:[#allocation5 + $0x84] ss:$16 sps:$4 sm:$0xff]  }
  0x3e   :  { %1289 = vmatpush1.bf16.msra.mxu0 %v2337_v6  ;;  %1461 = vmatpush1.bf16.msra.mxu1 %v2338_v7  ;;  %v2353_v17 = vld [vmem:[#allocation5 + $0x8c] ss:$16 sps:$4 sm:$0xff]   ;;  %v2355_v18 = vld [vmem:[#allocation5 + $0x80] ss:$16 sps:$4 sm:$0xff]   ;;  %v2356_v19 = vld [vmem:[#allocation5 + $0x88] ss:$16 sps:$4 sm:$0xff]  }
  0x3f   :  { %1290 = vmatprep.subr.bf16.mxu0 %v2339_v8  ;;  %1462 = vmatprep.subr.bf16.mxu1 %v2341_v9  ;;  %v2357_v20 = vld [vmem:[#allocation5 + $0xa4] ss:$16 sps:$4 sm:$0xff]   ;;  %v2359_v21 = vld [vmem:[#allocation5 + $0xac] ss:$16 sps:$4 sm:$0xff]   ;;  %v2361_v22 = vld [vmem:[#allocation5 + $0xa0] ss:$16 sps:$4 sm:$0xff]  }
  0x40   :  { %v2362_v23 = vld [vmem:[#allocation5 + $0xa8] ss:$16 sps:$4 sm:$0xff]   ;;  %v2363_v24 = vld [vmem:[#allocation5 + $0xc4] ss:$16 sps:$4 sm:$0xff]   ;;  %v2365_v25 = vld [vmem:[#allocation5 + $0xcc] ss:$16 sps:$4 sm:$0xff]  }
  0x41   :  { %v2367_v26 = vld [vmem:[#allocation5 + $0xc0] ss:$16 sps:$4 sm:$0xff]   ;;  %v2368_v27 = vld [vmem:[#allocation5 + $0xc8] ss:$16 sps:$4 sm:$0xff]   ;;  %v2369_v28 = vld [vmem:[#allocation5 + $0xe4] ss:$16 sps:$4 sm:$0xff]  }
  0x42   :  { %1291 = vmatpush1.bf16.msra.mxu0 %v2343_v10  ;;  %1463 = vmatpush1.bf16.msra.mxu1 %v2344_v11  ;;  %v2371_v29 = vld [vmem:[#allocation5 + $0xec] ss:$16 sps:$4 sm:$0xff]   ;;  %v2373_v30 = vld [vmem:[#allocation5 + $0xe0] ss:$16 sps:$4 sm:$0xff]   ;;  %v2374_v31 = vld [vmem:[#allocation5 + $0xe8] ss:$16 sps:$4 sm:$0xff]  }
  0x43   :  { %1292 = vmatprep.subr.bf16.mxu0 %v2345_v12  ;;  %1464 = vmatprep.subr.bf16.mxu1 %v2347_v13  ;;  %v2375_v32 = vld [vmem:[#allocation5 + $0x104] ss:$16 sps:$4 sm:$0xff]   ;;  %v2377_v33 = vld [vmem:[#allocation5 + $0x10c] ss:$16 sps:$4 sm:$0xff]   ;;  %v2379_v34 = vld [vmem:[#allocation5 + $0x100] ss:$16 sps:$4 sm:$0xff]  }
  0x44   :  { %v2380_v35 = vld [vmem:[#allocation5 + $0x108] ss:$16 sps:$4 sm:$0xff]   ;;  %v2381_v36 = vld [vmem:[#allocation5 + $0x124] ss:$16 sps:$4 sm:$0xff]   ;;  %v2383_v37 = vld [vmem:[#allocation5 + $0x12c] ss:$16 sps:$4 sm:$0xff]  }
  0x45   :  { %v2385_v38 = vld [vmem:[#allocation5 + $0x120] ss:$16 sps:$4 sm:$0xff]   ;;  %v2386_v39 = vld [vmem:[#allocation5 + $0x128] ss:$16 sps:$4 sm:$0xff]   ;;  %v2387_v40 = vld [vmem:[#allocation5 + $0x144] ss:$16 sps:$4 sm:$0xff]  }
  0x46   :  { %1293 = vmatpush1.bf16.msra.mxu0 %v2349_v14  ;;  %1465 = vmatpush1.bf16.msra.mxu1 %v2350_v15  ;;  %v2389_v41 = vld [vmem:[#allocation5 + $0x14c] ss:$16 sps:$4 sm:$0xff]   ;;  %v2391_v42 = vld [vmem:[#allocation5 + $0x140] ss:$16 sps:$4 sm:$0xff]   ;;  %v2392_v43 = vld [vmem:[#allocation5 + $0x148] ss:$16 sps:$4 sm:$0xff]  }
  0x47   :  { %1294 = vmatprep.subr.bf16.mxu0 %v2351_v16  ;;  %1466 = vmatprep.subr.bf16.mxu1 %v2353_v17  ;;  %v2393_v44 = vld [vmem:[#allocation5 + $0x164] ss:$16 sps:$4 sm:$0xff]   ;;  %v2395_v45 = vld [vmem:[#allocation5 + $0x16c] ss:$16 sps:$4 sm:$0xff]   ;;  %v2397_v48 = vld [vmem:[#allocation5 + $0x160] ss:$16 sps:$4 sm:$0xff]  }
  0x48   :  { %v64_v46 = vld [vmem:[#allocation2 + $0x8] sm:$0xff]  ;;  %v71_v47 = vld [vmem:[#allocation2 + $0x40] sm:$0xff]  ;;  %v70_v5 = vld [vmem:[#allocation2 + $0x38] sm:$0xff]  ;;  %vm1282_vm0 = vcmask 130048   ;;  %s2757_s10 = smov [#allocation8]  }
  0x49   :  { %v2398_v49 = vld [vmem:[#allocation5 + $0x168] ss:$16 sps:$4 sm:$0xff]   ;;  %v78_v50 = vpack.c.bf16 %v71_v47, %v64_v46  ;;  %v2399_v51 = vld [vmem:[#allocation5 + $0x184] ss:$16 sps:$4 sm:$0xff]   ;;  %v2401_v52 = vld [vmem:[#allocation5 + $0x18c] ss:$16 sps:$4 sm:$0xff]  }
  0x4a   :  { %1295 = vmatpush1.bf16.msra.mxu0 %v2355_v18  ;;  %1467 = vmatpush1.bf16.msra.mxu1 %v2356_v19  ;;  %v2403_v53 = vld [vmem:[#allocation5 + $0x180] ss:$16 sps:$4 sm:$0xff]   ;;  %v2404_v54 = vld [vmem:[#allocation5 + $0x188] ss:$16 sps:$4 sm:$0xff]   ;;  %v2405_v55 = vld [vmem:[#allocation5 + $0x1a4] ss:$16 sps:$4 sm:$0xff]  }
  0x4b   :  { %1296 = vmatprep.subr.bf16.mxu0 %v2357_v20  ;;  %1468 = vmatprep.subr.bf16.mxu1 %v2359_v21  ;;  %v2407_v56 = vld [vmem:[#allocation5 + $0x1ac] ss:$16 sps:$4 sm:$0xff]   ;;  %v2409_v57 = vld [vmem:[#allocation5 + $0x1a0] ss:$16 sps:$4 sm:$0xff]   ;;  %v2410_v58 = vld [vmem:[#allocation5 + $0x1a8] ss:$16 sps:$4 sm:$0xff]  }
  0x4c   :  { %1318 = vmatprep.mubr.bf16.mxu0 %v78_v50  ;;  %1490 = vmatprep.mubr.bf16.mxu1 %v78_v50  ;;  %v2411_v59 = vld [vmem:[#allocation5 + $0x1c4] ss:$16 sps:$4 sm:$0xff]   ;;  %v2413_v60 = vld [vmem:[#allocation5 + $0x1cc] ss:$16 sps:$4 sm:$0xff]   ;;  %v2415_v61 = vld [vmem:[#allocation5 + $0x1c0] ss:$16 sps:$4 sm:$0xff]  }
  0x4d   :  { %v2416_v62 = vld [vmem:[#allocation5 + $0x1c8] ss:$16 sps:$4 sm:$0xff]   ;;  %v2417_v63 = vld [vmem:[#allocation5 + $0x1e4] ss:$16 sps:$4 sm:$0xff]   ;;  %v2419_v0 = vld [vmem:[#allocation5 + $0x1ec] ss:$16 sps:$4 sm:$0xff]  }
  0x4e   :  { %1297 = vmatpush1.bf16.msra.mxu0 %v2361_v22  ;;  %1469 = vmatpush1.bf16.msra.mxu1 %v2362_v23  ;;  %v2421_v1 = vld [vmem:[#allocation5 + $0x1e0] ss:$16 sps:$4 sm:$0xff]   ;;  %v2422_v2 = vld [vmem:[#allocation5 + $0x1e8] ss:$16 sps:$4 sm:$0xff]   ;;  %v2425_v3 = vld [vmem:[#allocation5 + $0x204] ss:$16 sps:$4 sm:$0xff]  }
  0x4f   :  { %1298 = vmatprep.subr.bf16.mxu0 %v2363_v24  ;;  %1470 = vmatprep.subr.bf16.mxu1 %v2365_v25  ;;  %v63_v4 = vld [vmem:[#allocation2] sm:$0xff]  ;;  %v2428_v6 = vld [vmem:[#allocation5 + $0x20c] ss:$16 sps:$4 sm:$0xff]   ;;  %v2426_v8 = vld [vmem:[#allocation5 + $0x208] ss:$16 sps:$4 sm:$0xff]   ;;  %s1994_s11 = sshll.u32 %s2757_s10, 4  ;;  %s1995_s11 = int_to_ptr.vmem [resolvable:$true] %s1994_s11 }
  0x50   :  { %v2423_v7 = vld [vmem:[#allocation5 + $0x200] ss:$16 sps:$4 sm:$0xff]   ;;  %v77_v9 = vpack.c.bf16 %v70_v5, %v63_v4  ;;  %v2431_v10 = vld [vmem:[#allocation5 + $0x224] ss:$16 sps:$4 sm:$0xff]   ;;  %v2434_v11 = vld [vmem:[#allocation5 + $0x22c] ss:$16 sps:$4 sm:$0xff]   ;;  %p2724_p11 = scmp.lt.s32.totalorder %s1995_s11, %s1995_s11 }
  0x51   :  { %v2429_v12 = vld [vmem:[#allocation5 + $0x220] ss:$16 sps:$4 sm:$0xff]   ;;  %v2432_v13 = vld [vmem:[#allocation5 + $0x228] ss:$16 sps:$4 sm:$0xff]   ;;  %v2437_v14 = vld [vmem:[#allocation5 + $0x244] ss:$16 sps:$4 sm:$0xff]  }
  0x52   :  { %1299 = vmatpush1.bf16.msra.mxu0 %v2367_v26  ;;  %1471 = vmatpush1.bf16.msra.mxu1 %v2368_v27  ;;  %v2440_v15 = vld [vmem:[#allocation5 + $0x24c] ss:$16 sps:$4 sm:$0xff]   ;;  %v2435_v16 = vld [vmem:[#allocation5 + $0x240] ss:$16 sps:$4 sm:$0xff]   ;;  %v2438_v17 = vld [vmem:[#allocation5 + $0x248] ss:$16 sps:$4 sm:$0xff]  }
  0x53   :  { %1300 = vmatprep.subr.bf16.mxu0 %v2369_v28  ;;  %1472 = vmatprep.subr.bf16.mxu1 %v2371_v29  ;;  %v2443_v18 = vld [vmem:[#allocation5 + $0x264] ss:$16 sps:$4 sm:$0xff]   ;;  %v2446_v19 = vld [vmem:[#allocation5 + $0x26c] ss:$16 sps:$4 sm:$0xff]   ;;  %v2441_v20 = vld [vmem:[#allocation5 + $0x260] ss:$16 sps:$4 sm:$0xff]  }
  0x54   :  { %v2444_v21 = vld [vmem:[#allocation5 + $0x268] ss:$16 sps:$4 sm:$0xff]   ;;  %v2449_v22 = vld [vmem:[#allocation5 + $0x284] ss:$16 sps:$4 sm:$0xff]   ;;  %v2452_v23 = vld [vmem:[#allocation5 + $0x28c] ss:$16 sps:$4 sm:$0xff]  }
  0x55   :  { %v2447_v24 = vld [vmem:[#allocation5 + $0x280] ss:$16 sps:$4 sm:$0xff]   ;;  %v2450_v25 = vld [vmem:[#allocation5 + $0x288] ss:$16 sps:$4 sm:$0xff]   ;;  %v2455_v26 = vld [vmem:[#allocation5 + $0x2a4] ss:$16 sps:$4 sm:$0xff]  }
  0x56   :  { %1301 = vmatpush1.bf16.msra.mxu0 %v2373_v30  ;;  %1473 = vmatpush1.bf16.msra.mxu1 %v2374_v31  ;;  %v2458_v27 = vld [vmem:[#allocation5 + $0x2ac] ss:$16 sps:$4 sm:$0xff]   ;;  %v2453_v28 = vld [vmem:[#allocation5 + $0x2a0] ss:$16 sps:$4 sm:$0xff]   ;;  %v2456_v29 = vld [vmem:[#allocation5 + $0x2a8] ss:$16 sps:$4 sm:$0xff]  }
  0x57   :  { %1302 = vmatprep.subr.bf16.mxu0 %v2375_v32  ;;  %1474 = vmatprep.subr.bf16.mxu1 %v2377_v33  ;;  %v2461_v30 = vld [vmem:[#allocation5 + $0x2c4] ss:$16 sps:$4 sm:$0xff]   ;;  %v2464_v31 = vld [vmem:[#allocation5 + $0x2cc] ss:$16 sps:$4 sm:$0xff]   ;;  %v2477_v47 = vld [vmem:[#allocation5 + $0x320] ss:$16 sps:$4 sm:$0xff]  }
  0x58   :  { %v66_v32 = vld [vmem:[#allocation2 + $0x18] sm:$0xff]  ;;  %v73_v33 = vld [vmem:[#allocation2 + $0x50] sm:$0xff] }
  0x59   :  { %v2482_v46 = vld [vmem:[#allocation5 + $0x32c] ss:$16 sps:$4 sm:$0xff]   ;;  %v2510_v4 = vld [vmem:[#allocation5 + $0x3c8] ss:$16 sps:$4 sm:$0xff]   ;;  %v2515_v5 = vld [vmem:[#allocation5 + $0x3e4] ss:$16 sps:$4 sm:$0xff]  }
  0x5a   :  { %1303 = vmatpush1.bf16.msra.mxu0 %v2379_v34  ;;  %1475 = vmatpush1.bf16.msra.mxu1 %v2380_v35  ;;  %v2459_v34 = vld [vmem:[#allocation5 + $0x2c0] ss:$16 sps:$4 sm:$0xff]   ;;  %v2462_v35 = vld [vmem:[#allocation5 + $0x2c8] ss:$16 sps:$4 sm:$0xff]   ;;  %v2488_v50 = vld [vmem:[#allocation5 + $0x34c] ss:$16 sps:$4 sm:$0xff]  }
  0x5b   :  { %1304 = vmatprep.subr.bf16.mxu0 %v2381_v36  ;;  %1476 = vmatprep.subr.bf16.mxu1 %v2383_v37  ;;  %v80_v36 = vpack.c.bf16 %v73_v33, %v66_v32  ;;  %v2467_v37 = vld [vmem:[#allocation5 + $0x2e4] ss:$16 sps:$4 sm:$0xff]   ;;  %v2548_v32 = vld [vmem:[#allocation5 + $0x48c] ss:$16 sps:$4 sm:$0xff]   ;;  %v2543_v33 = vld [vmem:[#allocation5 + $0x480] ss:$16 sps:$4 sm:$0xff]  }
  0x5e   :  { %1305 = vmatpush1.bf16.msra.mxu0 %v2385_v38  ;;  %1477 = vmatpush1.bf16.msra.mxu1 %v2386_v39  ;;  %v2470_v38 = vld [vmem:[#allocation5 + $0x2ec] ss:$16 sps:$4 sm:$0xff]   ;;  %v2465_v39 = vld [vmem:[#allocation5 + $0x2e0] ss:$16 sps:$4 sm:$0xff]  }
  0x5f   :  { %1306 = vmatprep.subr.bf16.mxu0 %v2387_v40  ;;  %1478 = vmatprep.subr.bf16.mxu1 %v2389_v41  ;;  %v2468_v40 = vld [vmem:[#allocation5 + $0x2e8] ss:$16 sps:$4 sm:$0xff]   ;;  %v2473_v41 = vld [vmem:[#allocation5 + $0x304] ss:$16 sps:$4 sm:$0xff]  }
  0x62   :  { %1307 = vmatpush1.bf16.msra.mxu0 %v2391_v42  ;;  %1479 = vmatpush1.bf16.msra.mxu1 %v2392_v43  ;;  %v2476_v42 = vld [vmem:[#allocation5 + $0x30c] ss:$16 sps:$4 sm:$0xff]   ;;  %v2471_v43 = vld [vmem:[#allocation5 + $0x300] ss:$16 sps:$4 sm:$0xff]  }
  0x63   :  { %1308 = vmatprep.subr.bf16.mxu0 %v2393_v44  ;;  %1480 = vmatprep.subr.bf16.mxu1 %v2395_v45  ;;  %v2474_v44 = vld [vmem:[#allocation5 + $0x308] ss:$16 sps:$4 sm:$0xff]   ;;  %v2479_v45 = vld [vmem:[#allocation5 + $0x324] ss:$16 sps:$4 sm:$0xff]  }
  0x66   :  { %1309 = vmatpush1.bf16.msra.mxu0 %v2397_v48  ;;  %1481 = vmatpush1.bf16.msra.mxu1 %v2398_v49  ;;  %v2480_v48 = vld [vmem:[#allocation5 + $0x328] ss:$16 sps:$4 sm:$0xff]   ;;  %v2485_v49 = vld [vmem:[#allocation5 + $0x344] ss:$16 sps:$4 sm:$0xff]  }
  0x67   :  { %1310 = vmatprep.subr.bf16.mxu0 %v2399_v51  ;;  %1482 = vmatprep.subr.bf16.mxu1 %v2401_v52  ;;  %v2483_v51 = vld [vmem:[#allocation5 + $0x340] ss:$16 sps:$4 sm:$0xff]   ;;  %v2486_v52 = vld [vmem:[#allocation5 + $0x348] ss:$16 sps:$4 sm:$0xff]  }
  0x6a   :  { %1311 = vmatpush1.bf16.msra.mxu0 %v2403_v53  ;;  %1483 = vmatpush1.bf16.msra.mxu1 %v2404_v54  ;;  %v2491_v53 = vld [vmem:[#allocation5 + $0x364] ss:$16 sps:$4 sm:$0xff]   ;;  %v2494_v54 = vld [vmem:[#allocation5 + $0x36c] ss:$16 sps:$4 sm:$0xff]  }
  0x6b   :  { %1312 = vmatprep.subr.bf16.mxu0 %v2405_v55  ;;  %1484 = vmatprep.subr.bf16.mxu1 %v2407_v56  ;;  %v2489_v55 = vld [vmem:[#allocation5 + $0x360] ss:$16 sps:$4 sm:$0xff]   ;;  %v2492_v56 = vld [vmem:[#allocation5 + $0x368] ss:$16 sps:$4 sm:$0xff]  }
  0x6e   :  { %1313 = vmatpush1.bf16.msra.mxu0 %v2409_v57  ;;  %1485 = vmatpush1.bf16.msra.mxu1 %v2410_v58  ;;  %v2497_v57 = vld [vmem:[#allocation5 + $0x384] ss:$16 sps:$4 sm:$0xff]   ;;  %v2500_v58 = vld [vmem:[#allocation5 + $0x38c] ss:$16 sps:$4 sm:$0xff]  }
  0x6f   :  { %1314 = vmatprep.subr.bf16.mxu0 %v2411_v59  ;;  %1486 = vmatprep.subr.bf16.mxu1 %v2413_v60  ;;  %v2495_v59 = vld [vmem:[#allocation5 + $0x380] ss:$16 sps:$4 sm:$0xff]   ;;  %v2498_v60 = vld [vmem:[#allocation5 + $0x388] ss:$16 sps:$4 sm:$0xff]  }
  0x72   :  { %1315 = vmatpush1.bf16.msra.mxu0 %v2415_v61  ;;  %1487 = vmatpush1.bf16.msra.mxu1 %v2416_v62  ;;  %v2503_v61 = vld [vmem:[#allocation5 + $0x3a4] ss:$16 sps:$4 sm:$0xff]   ;;  %v2506_v62 = vld [vmem:[#allocation5 + $0x3ac] ss:$16 sps:$4 sm:$0xff]  }
  0x73   :  { %1316 = vmatprep.subr.bf16.mxu0 %v2417_v63  ;;  %1488 = vmatprep.subr.bf16.mxu1 %v2419_v0  ;;  %v2501_v63 = vld [vmem:[#allocation5 + $0x3a0] ss:$16 sps:$4 sm:$0xff]   ;;  %v2504_v0 = vld [vmem:[#allocation5 + $0x3a8] ss:$16 sps:$4 sm:$0xff]  }
  0x76   :  { %1317 = vmatpush1.bf16.msra.mxu0 %v2421_v1  ;;  %1489 = vmatpush1.bf16.msra.mxu1 %v2422_v2  ;;  %v2509_v1 = vld [vmem:[#allocation5 + $0x3c4] ss:$16 sps:$4 sm:$0xff]   ;;  %v2512_v2 = vld [vmem:[#allocation5 + $0x3cc] ss:$16 sps:$4 sm:$0xff]  }
  0x77   :  { %1329 = vmatprep.subr.bf16.mxu0 %v2425_v3  ;;  %1501 = vmatprep.subr.bf16.mxu1 %v2428_v6  ;;  %v2507_v3 = vld [vmem:[#allocation5 + $0x3c0] ss:$16 sps:$4 sm:$0xff]   ;;  %v2518_v6 = vld [vmem:[#allocation5 + $0x3ec] ss:$16 sps:$4 sm:$0xff]  }
  0x79   :  { %1319 = vmatmul.mubr.bf16.vlgmr.msra.gmra.mrb[0].mxu0 %v77_v9  ;;  %1491 = vmatmul.mubr.bf16.vlgmr.msra.gmra.mrb[0].mxu1 %v77_v9  ;;  %v2521_v9 = vld [vmem:[#allocation5 + $0x404] ss:$16 sps:$4 sm:$0xff]  }
  0x7a   :  { %1330 = vmatpush1.bf16.msra.mxu0 %v2423_v7  ;;  %1502 = vmatpush1.bf16.msra.mxu1 %v2426_v8  ;;  %v2513_v7 = vld [vmem:[#allocation5 + $0x3e0] ss:$16 sps:$4 sm:$0xff]   ;;  %v2516_v8 = vld [vmem:[#allocation5 + $0x3e8] ss:$16 sps:$4 sm:$0xff]  }
  0x7b   :  { %1331 = vmatprep.subr.bf16.mxu0 %v2431_v10  ;;  %1503 = vmatprep.subr.bf16.mxu1 %v2434_v11  ;;  %v65_v10 = vld [vmem:[#allocation2 + $0x10] sm:$0xff]  ;;  %v72_v11 = vld [vmem:[#allocation2 + $0x48] sm:$0xff] }
  0x7c   :  { %1361 = vmatprep.mubr.bf16.mxu0 %v80_v36  ;;  %1533 = vmatprep.mubr.bf16.mxu1 %v80_v36  ;;  %v2554_v36 = vld [vmem:[#allocation5 + $0x4ac] ss:$16 sps:$4 sm:$0xff]  }
  0x7e   :  { %1332 = vmatpush1.bf16.msra.mxu0 %v2429_v12  ;;  %1504 = vmatpush1.bf16.msra.mxu1 %v2432_v13  ;;  %v2524_v12 = vld [vmem:[#allocation5 + $0x40c] ss:$16 sps:$4 sm:$0xff]   ;;  %v2519_v13 = vld [vmem:[#allocation5 + $0x400] ss:$16 sps:$4 sm:$0xff]  }
  0x7f   :  { %1333 = vmatprep.subr.bf16.mxu0 %v2437_v14  ;;  %1505 = vmatprep.subr.bf16.mxu1 %v2440_v15  ;;  %v2522_v14 = vld [vmem:[#allocation5 + $0x408] ss:$16 sps:$4 sm:$0xff]   ;;  %v79_v15 = vpack.c.bf16 %v72_v11, %v65_v10  ;;  %v2611_v11 = vld [vmem:[#allocation5 + $0x5e4] ss:$16 sps:$4 sm:$0xff]  }
  0x80   :  { %v2606_v10 = vld [vmem:[#allocation5 + $0x5c8] ss:$16 sps:$4 sm:$0xff]  }
  0x82   :  { %1334 = vmatpush1.bf16.msra.mxu0 %v2435_v16  ;;  %1506 = vmatpush1.bf16.msra.mxu1 %v2438_v17  ;;  %v2527_v16 = vld [vmem:[#allocation5 + $0x424] ss:$16 sps:$4 sm:$0xff]   ;;  %v2530_v17 = vld [vmem:[#allocation5 + $0x42c] ss:$16 sps:$4 sm:$0xff]  }
  0x83   :  { %1335 = vmatprep.subr.bf16.mxu0 %v2443_v18  ;;  %1507 = vmatprep.subr.bf16.mxu1 %v2446_v19  ;;  %v68_v18 = vld [vmem:[#allocation2 + $0x28] sm:$0xff]  ;;  %v2525_v19 = vld [vmem:[#allocation5 + $0x420] ss:$16 sps:$4 sm:$0xff]  }
  0x86   :  { %1336 = vmatpush1.bf16.msra.mxu0 %v2441_v20  ;;  %1508 = vmatpush1.bf16.msra.mxu1 %v2444_v21  ;;  %v2528_v20 = vld [vmem:[#allocation5 + $0x428] ss:$16 sps:$4 sm:$0xff]   ;;  %v75_v21 = vld [vmem:[#allocation2 + $0x60] sm:$0xff] }
  0x87   :  { %1337 = vmatprep.subr.bf16.mxu0 %v2449_v22  ;;  %1509 = vmatprep.subr.bf16.mxu1 %v2452_v23  ;;  %v2533_v22 = vld [vmem:[#allocation5 + $0x444] ss:$16 sps:$4 sm:$0xff]   ;;  %v82_v23 = vpack.c.bf16 %v75_v21, %v68_v18  ;;  %v2620_v18 = vld [vmem:[#allocation5 + $0x60c] ss:$16 sps:$4 sm:$0xff]   ;;  %v2618_v21 = vld [vmem:[#allocation5 + $0x608] ss:$16 sps:$4 sm:$0xff]  }
  0x8a   :  { %1338 = vmatpush1.bf16.msra.mxu0 %v2447_v24  ;;  %1510 = vmatpush1.bf16.msra.mxu1 %v2450_v25  ;;  %v2536_v24 = vld [vmem:[#allocation5 + $0x44c] ss:$16 sps:$4 sm:$0xff]   ;;  %v2531_v25 = vld [vmem:[#allocation5 + $0x440] ss:$16 sps:$4 sm:$0xff]  }
  0x8b   :  { %1339 = vmatprep.subr.bf16.mxu0 %v2455_v26  ;;  %1511 = vmatprep.subr.bf16.mxu1 %v2458_v27  ;;  %v2534_v26 = vld [vmem:[#allocation5 + $0x448] ss:$16 sps:$4 sm:$0xff]   ;;  %v2539_v27 = vld [vmem:[#allocation5 + $0x464] ss:$16 sps:$4 sm:$0xff]  }
  0x8e   :  { %1340 = vmatpush1.bf16.msra.mxu0 %v2453_v28  ;;  %1512 = vmatpush1.bf16.msra.mxu1 %v2456_v29  ;;  %v2542_v28 = vld [vmem:[#allocation5 + $0x46c] ss:$16 sps:$4 sm:$0xff]   ;;  %v2537_v29 = vld [vmem:[#allocation5 + $0x460] ss:$16 sps:$4 sm:$0xff]  }
  0x8f   :  { %1341 = vmatprep.subr.bf16.mxu0 %v2461_v30  ;;  %1513 = vmatprep.subr.bf16.mxu1 %v2464_v31  ;;  %v2540_v30 = vld [vmem:[#allocation5 + $0x468] ss:$16 sps:$4 sm:$0xff]   ;;  %v2545_v31 = vld [vmem:[#allocation5 + $0x484] ss:$16 sps:$4 sm:$0xff]  }
  0x92   :  { %1342 = vmatpush1.bf16.msra.mxu0 %v2459_v34  ;;  %1514 = vmatpush1.bf16.msra.mxu1 %v2462_v35  ;;  %v2546_v34 = vld [vmem:[#allocation5 + $0x488] ss:$16 sps:$4 sm:$0xff]   ;;  %v2551_v35 = vld [vmem:[#allocation5 + $0x4a4] ss:$16 sps:$4 sm:$0xff]  }
  0x93   :  { %1343 = vmatprep.subr.bf16.mxu0 %v2467_v37  ;;  %1515 = vmatprep.subr.bf16.mxu1 %v2470_v38  ;;  %v2549_v37 = vld [vmem:[#allocation5 + $0x4a0] ss:$16 sps:$4 sm:$0xff]   ;;  %v2552_v38 = vld [vmem:[#allocation5 + $0x4a8] ss:$16 sps:$4 sm:$0xff]  }
  0x96   :  { %1344 = vmatpush1.bf16.msra.mxu0 %v2465_v39  ;;  %1516 = vmatpush1.bf16.msra.mxu1 %v2468_v40  ;;  %v2557_v39 = vld [vmem:[#allocation5 + $0x4c4] ss:$16 sps:$4 sm:$0xff]   ;;  %v2560_v40 = vld [vmem:[#allocation5 + $0x4cc] ss:$16 sps:$4 sm:$0xff]  }
  0x97   :  { %1345 = vmatprep.subr.bf16.mxu0 %v2473_v41  ;;  %1517 = vmatprep.subr.bf16.mxu1 %v2476_v42  ;;  %v2555_v41 = vld [vmem:[#allocation5 + $0x4c0] ss:$16 sps:$4 sm:$0xff]   ;;  %v2558_v42 = vld [vmem:[#allocation5 + $0x4c8] ss:$16 sps:$4 sm:$0xff]  }
  0x9a   :  { %1346 = vmatpush1.bf16.msra.mxu0 %v2471_v43  ;;  %1518 = vmatpush1.bf16.msra.mxu1 %v2474_v44  ;;  %v2563_v43 = vld [vmem:[#allocation5 + $0x4e4] ss:$16 sps:$4 sm:$0xff]   ;;  %v2566_v44 = vld [vmem:[#allocation5 + $0x4ec] ss:$16 sps:$4 sm:$0xff]  }
  0x9b   :  { %1347 = vmatprep.subr.bf16.mxu0 %v2479_v45  ;;  %1519 = vmatprep.subr.bf16.mxu1 %v2482_v46  ;;  %v2561_v45 = vld [vmem:[#allocation5 + $0x4e0] ss:$16 sps:$4 sm:$0xff]   ;;  %v2564_v46 = vld [vmem:[#allocation5 + $0x4e8] ss:$16 sps:$4 sm:$0xff]  }
  0x9e   :  { %1348 = vmatpush1.bf16.msra.mxu0 %v2477_v47  ;;  %1520 = vmatpush1.bf16.msra.mxu1 %v2480_v48  ;;  %v2569_v47 = vld [vmem:[#allocation5 + $0x504] ss:$16 sps:$4 sm:$0xff]   ;;  %v2572_v48 = vld [vmem:[#allocation5 + $0x50c] ss:$16 sps:$4 sm:$0xff]  }
  0x9f   :  { %1349 = vmatprep.subr.bf16.mxu0 %v2485_v49  ;;  %1521 = vmatprep.subr.bf16.mxu1 %v2488_v50  ;;  %v2567_v49 = vld [vmem:[#allocation5 + $0x500] ss:$16 sps:$4 sm:$0xff]   ;;  %v2570_v50 = vld [vmem:[#allocation5 + $0x508] ss:$16 sps:$4 sm:$0xff]  }
  0xa2   :  { %1350 = vmatpush1.bf16.msra.mxu0 %v2483_v51  ;;  %1522 = vmatpush1.bf16.msra.mxu1 %v2486_v52  ;;  %v2575_v51 = vld [vmem:[#allocation5 + $0x524] ss:$16 sps:$4 sm:$0xff]   ;;  %v2578_v52 = vld [vmem:[#allocation5 + $0x52c] ss:$16 sps:$4 sm:$0xff]  }
  0xa3   :  { %1351 = vmatprep.subr.bf16.mxu0 %v2491_v53  ;;  %1523 = vmatprep.subr.bf16.mxu1 %v2494_v54  ;;  %v2573_v53 = vld [vmem:[#allocation5 + $0x520] ss:$16 sps:$4 sm:$0xff]   ;;  %v2576_v54 = vld [vmem:[#allocation5 + $0x528] ss:$16 sps:$4 sm:$0xff]  }
  0xa6   :  { %1352 = vmatpush1.bf16.msra.mxu0 %v2489_v55  ;;  %1524 = vmatpush1.bf16.msra.mxu1 %v2492_v56  ;;  %v2581_v55 = vld [vmem:[#allocation5 + $0x544] ss:$16 sps:$4 sm:$0xff]   ;;  %v2584_v56 = vld [vmem:[#allocation5 + $0x54c] ss:$16 sps:$4 sm:$0xff]  }
  0xa7   :  { %1353 = vmatprep.subr.bf16.mxu0 %v2497_v57  ;;  %1525 = vmatprep.subr.bf16.mxu1 %v2500_v58  ;;  %v2579_v57 = vld [vmem:[#allocation5 + $0x540] ss:$16 sps:$4 sm:$0xff]   ;;  %v2582_v58 = vld [vmem:[#allocation5 + $0x548] ss:$16 sps:$4 sm:$0xff]  }
  0xaa   :  { %1354 = vmatpush1.bf16.msra.mxu0 %v2495_v59  ;;  %1526 = vmatpush1.bf16.msra.mxu1 %v2498_v60  ;;  %v2587_v59 = vld [vmem:[#allocation5 + $0x564] ss:$16 sps:$4 sm:$0xff]   ;;  %v2590_v60 = vld [vmem:[#allocation5 + $0x56c] ss:$16 sps:$4 sm:$0xff]  }
  0xab   :  { %1355 = vmatprep.subr.bf16.mxu0 %v2503_v61  ;;  %1527 = vmatprep.subr.bf16.mxu1 %v2506_v62  ;;  %v2585_v61 = vld [vmem:[#allocation5 + $0x560] ss:$16 sps:$4 sm:$0xff]   ;;  %v2588_v62 = vld [vmem:[#allocation5 + $0x568] ss:$16 sps:$4 sm:$0xff]  }
  0xae   :  { %1356 = vmatpush1.bf16.msra.mxu0 %v2501_v63  ;;  %1528 = vmatpush1.bf16.msra.mxu1 %v2504_v0  ;;  %v2593_v63 = vld [vmem:[#allocation5 + $0x584] ss:$16 sps:$4 sm:$0xff]   ;;  %v2596_v0 = vld [vmem:[#allocation5 + $0x58c] ss:$16 sps:$4 sm:$0xff]  }
  0xaf   :  { %1357 = vmatprep.subr.bf16.mxu0 %v2509_v1  ;;  %1529 = vmatprep.subr.bf16.mxu1 %v2512_v2  ;;  %v2591_v1 = vld [vmem:[#allocation5 + $0x580] ss:$16 sps:$4 sm:$0xff]   ;;  %v2594_v2 = vld [vmem:[#allocation5 + $0x588] ss:$16 sps:$4 sm:$0xff]  }
  0xb2   :  { %1358 = vmatpush1.bf16.msra.mxu0 %v2507_v3  ;;  %1530 = vmatpush1.bf16.msra.mxu1 %v2510_v4  ;;  %v2599_v3 = vld [vmem:[#allocation5 + $0x5a4] ss:$16 sps:$4 sm:$0xff]   ;;  %v2602_v4 = vld [vmem:[#allocation5 + $0x5ac] ss:$16 sps:$4 sm:$0xff]  }
  0xb3   :  { %1359 = vmatprep.subr.bf16.mxu0 %v2515_v5  ;;  %1531 = vmatprep.subr.bf16.mxu1 %v2518_v6  ;;  %v2597_v5 = vld [vmem:[#allocation5 + $0x5a0] ss:$16 sps:$4 sm:$0xff]   ;;  %v2600_v6 = vld [vmem:[#allocation5 + $0x5a8] ss:$16 sps:$4 sm:$0xff]  }
  0xb6   :  { %1360 = vmatpush1.bf16.msra.mxu0 %v2513_v7  ;;  %1532 = vmatpush1.bf16.msra.mxu1 %v2516_v8  ;;  %v2605_v7 = vld [vmem:[#allocation5 + $0x5c4] ss:$16 sps:$4 sm:$0xff]   ;;  %v2608_v8 = vld [vmem:[#allocation5 + $0x5cc] ss:$16 sps:$4 sm:$0xff]  }
  0xb7   :  { %1372 = vmatprep.subr.bf16.mxu0 %v2521_v9  ;;  %1544 = vmatprep.subr.bf16.mxu1 %v2524_v12  ;;  %v2603_v9 = vld [vmem:[#allocation5 + $0x5c0] ss:$16 sps:$4 sm:$0xff]   ;;  %v2614_v12 = vld [vmem:[#allocation5 + $0x5ec] ss:$16 sps:$4 sm:$0xff]  }
  0xb9   :  { %1362 = vmatmul.mubr.bf16.vlgmr.msra.gmra.mrb[0].mxu0 %v79_v15  ;;  %1534 = vmatmul.mubr.bf16.vlgmr.msra.gmra.mrb[0].mxu1 %v79_v15  ;;  %v67_v15 = vld [vmem:[#allocation2 + $0x20] sm:$0xff] }
  0xba   :  { %1373 = vmatpush1.bf16.msra.mxu0 %v2519_v13  ;;  %1545 = vmatpush1.bf16.msra.mxu1 %v2522_v14  ;;  %v2609_v13 = vld [vmem:[#allocation5 + $0x5e0] ss:$16 sps:$4 sm:$0xff]   ;;  %v2612_v14 = vld [vmem:[#allocation5 + $0x5e8] ss:$16 sps:$4 sm:$0xff]  }
  0xbb   :  { %1374 = vmatprep.subr.bf16.mxu0 %v2527_v16  ;;  %1546 = vmatprep.subr.bf16.mxu1 %v2530_v17  ;;  %v74_v16 = vld [vmem:[#allocation2 + $0x58] sm:$0xff]  ;;  %v2617_v17 = vld [vmem:[#allocation5 + $0x604] ss:$16 sps:$4 sm:$0xff]  }
  0xbc   :  { %1404 = vmatprep.mubr.bf16.mxu0 %v82_v23  ;;  %1576 = vmatprep.mubr.bf16.mxu1 %v82_v23  ;;  %v2622_v23 = vld [vmem:[#allocation7 + $0xc0] sm:$0xff]  }
  0xbe   :  { %1375 = vmatpush1.bf16.msra.mxu0 %v2525_v19  ;;  %1547 = vmatpush1.bf16.msra.mxu1 %v2528_v20  ;;  %v81_v19 = vpack.c.bf16 %v74_v16, %v67_v15  ;;  %v2615_v20 = vld [vmem:[#allocation5 + $0x600] ss:$16 sps:$4 sm:$0xff]  }
  0xbf   :  { %1376 = vmatprep.subr.bf16.mxu0 %v2533_v22  ;;  %1548 = vmatprep.subr.bf16.mxu1 %v2536_v24  ;;  %v2621_v22 = vld [vmem:[#allocation7 + $0x40] sm:$0xff]   ;;  %v2756_v24 = vmov 0  }
  0xc2   :  { %1377 = vmatpush1.bf16.msra.mxu0 %v2531_v25  ;;  %1549 = vmatpush1.bf16.msra.mxu1 %v2534_v26  ;;  %v69_v25 = vld [vmem:[#allocation2 + $0x30] sm:$0xff]  ;;  %v76_v26 = vld [vmem:[#allocation2 + $0x68] sm:$0xff] }
  0xc3   :  { %1378 = vmatprep.subr.bf16.mxu0 %v2539_v27  ;;  %1550 = vmatprep.subr.bf16.mxu1 %v2542_v28  ;;  %v83_v27 = vpack.c.bf16 %v76_v26, %v69_v25  ;;  %v2623_v28 = vld [vmem:[#allocation7] sm:$0xff]  }
  0xc6   :  { %1379 = vmatpush1.bf16.msra.mxu0 %v2537_v29  ;;  %1551 = vmatpush1.bf16.msra.mxu1 %v2540_v30  ;;  %v2624_v29 = vld [vmem:[#allocation7 + $0x80] sm:$0xff]   ;;  %v2625_v30 = vld [vmem:[#allocation7 + $0x48] sm:$0xff]  }
  0xc7   :  { %1380 = vmatprep.subr.bf16.mxu0 %v2545_v31  ;;  %1552 = vmatprep.subr.bf16.mxu1 %v2548_v32  ;;  %v2626_v31 = vld [vmem:[#allocation7 + $0xc8] sm:$0xff]  }
  0xc8   :  { %v2627_v32 = vld [vmem:[#allocation7 + $0x8] sm:$0xff]  }
  0xca   :  { %1381 = vmatpush1.bf16.msra.mxu0 %v2543_v33  ;;  %1553 = vmatpush1.bf16.msra.mxu1 %v2546_v34  ;;  %v2628_v33 = vld [vmem:[#allocation7 + $0x88] sm:$0xff]   ;;  %v2629_v34 = vld [vmem:[#allocation7 + $0x50] sm:$0xff]  }
  0xcb   :  { %1382 = vmatprep.subr.bf16.mxu0 %v2551_v35  ;;  %1554 = vmatprep.subr.bf16.mxu1 %v2554_v36  ;;  %v2630_v35 = vld [vmem:[#allocation7 + $0xd0] sm:$0xff]  }
  0xcc   :  { %v2631_v36 = vld [vmem:[#allocation7 + $0x10] sm:$0xff]  }
  0xce   :  { %1383 = vmatpush1.bf16.msra.mxu0 %v2549_v37  ;;  %1555 = vmatpush1.bf16.msra.mxu1 %v2552_v38  ;;  %v2632_v37 = vld [vmem:[#allocation7 + $0x90] sm:$0xff]   ;;  %v2633_v38 = vld [vmem:[#allocation7 + $0x58] sm:$0xff]  }
  0xcf   :  { %1384 = vmatprep.subr.bf16.mxu0 %v2557_v39  ;;  %1556 = vmatprep.subr.bf16.mxu1 %v2560_v40  ;;  %v2634_v39 = vld [vmem:[#allocation7 + $0xd8] sm:$0xff]  }
  0xd0   :  { %v2635_v40 = vld [vmem:[#allocation7 + $0x18] sm:$0xff]  }
  0xd2   :  { %1385 = vmatpush1.bf16.msra.mxu0 %v2555_v41  ;;  %1557 = vmatpush1.bf16.msra.mxu1 %v2558_v42  ;;  %v2636_v41 = vld [vmem:[#allocation7 + $0x98] sm:$0xff]   ;;  %v2637_v42 = vld [vmem:[#allocation7 + $0x60] sm:$0xff]  }
  0xd3   :  { %1386 = vmatprep.subr.bf16.mxu0 %v2563_v43  ;;  %1558 = vmatprep.subr.bf16.mxu1 %v2566_v44  ;;  %v2638_v43 = vld [vmem:[#allocation7 + $0xe0] sm:$0xff]  }
  0xd4   :  { %v2639_v44 = vld [vmem:[#allocation7 + $0x20] sm:$0xff]  }
  0xd6   :  { %1387 = vmatpush1.bf16.msra.mxu0 %v2561_v45  ;;  %1559 = vmatpush1.bf16.msra.mxu1 %v2564_v46  ;;  %v2640_v45 = vld [vmem:[#allocation7 + $0xa0] sm:$0xff]   ;;  %v2641_v46 = vld [vmem:[#allocation7 + $0x68] sm:$0xff]  }
  0xd7   :  { %1388 = vmatprep.subr.bf16.mxu0 %v2569_v47  ;;  %1560 = vmatprep.subr.bf16.mxu1 %v2572_v48  ;;  %v2642_v47 = vld [vmem:[#allocation7 + $0xe8] sm:$0xff]  }
  0xd8   :  { %v2643_v48 = vld [vmem:[#allocation7 + $0x28] sm:$0xff]  }
  0xda   :  { %1389 = vmatpush1.bf16.msra.mxu0 %v2567_v49  ;;  %1561 = vmatpush1.bf16.msra.mxu1 %v2570_v50  ;;  %v2644_v49 = vld [vmem:[#allocation7 + $0xa8] sm:$0xff]   ;;  %v2645_v50 = vld [vmem:[#allocation7 + $0x70] sm:$0xff]  }
  0xdb   :  { %1390 = vmatprep.subr.bf16.mxu0 %v2575_v51  ;;  %1562 = vmatprep.subr.bf16.mxu1 %v2578_v52  ;;  %v2646_v51 = vld [vmem:[#allocation7 + $0xf0] sm:$0xff]  }
  0xdc   :  { %v2647_v52 = vld [vmem:[#allocation7 + $0x30] sm:$0xff]  }
  0xde   :  { %1391 = vmatpush1.bf16.msra.mxu0 %v2573_v53  ;;  %1563 = vmatpush1.bf16.msra.mxu1 %v2576_v54  ;;  %v2648_v53 = vld [vmem:[#allocation7 + $0xb0] sm:$0xff]   ;;  %v2649_v54 = vld [vmem:[#allocation7 + $0x78] sm:$0xff]  }
  0xdf   :  { %1392 = vmatprep.subr.bf16.mxu0 %v2581_v55  ;;  %1564 = vmatprep.subr.bf16.mxu1 %v2584_v56  ;;  %v2650_v55 = vld [vmem:[#allocation7 + $0xf8] sm:$0xff]  }
  0xe0   :  { %v2651_v56 = vld [vmem:[#allocation7 + $0x38] sm:$0xff]  }
  0xe2   :  { %1393 = vmatpush1.bf16.msra.mxu0 %v2579_v57  ;;  %1565 = vmatpush1.bf16.msra.mxu1 %v2582_v58  ;;  %v2652_v57 = vld [vmem:[#allocation7 + $0xb8] sm:$0xff]   ;;  %v282_v58 = vlaneseq }
  0xe3   :  { %1394 = vmatprep.subr.bf16.mxu0 %v2587_v59  ;;  %1566 = vmatprep.subr.bf16.mxu1 %v2590_v60 }
  0xe4   :  { %v283_v59 = vshrl.u32 %v282_v58, 7 }
  0xe6   :  { %1395 = vmatpush1.bf16.msra.mxu0 %v2585_v61  ;;  %1567 = vmatpush1.bf16.msra.mxu1 %v2588_v62  ;;  %v284_v60 = vsub.s32 0, %v283_v59  ;;  %v292_v61 = vsub.s32 2, %v283_v59  ;;  %v280_v62 = vld [vmem:[%s2846_s2] sm:$0xf] }
  0xe7   :  { %1396 = vmatprep.subr.bf16.mxu0 %v2593_v63  ;;  %1568 = vmatprep.subr.bf16.mxu1 %v2596_v0  ;;  %v288_v63 = vsub.s32 1, %v283_v59  ;;  %v296_v0 = vsub.s32 3, %v283_v59 }
  0xea   :  { %1397 = vmatpush1.bf16.msra.mxu0 %v2591_v1  ;;  %1569 = vmatpush1.bf16.msra.mxu1 %v2594_v2  ;;  %v285_v1 = vrot.slane %v280_v62, %v284_v60  ;;  %v293_v2 = vrot.slane %v280_v62, %v292_v61 }
  0xeb   :  { %1398 = vmatprep.subr.bf16.mxu0 %v2599_v3  ;;  %1570 = vmatprep.subr.bf16.mxu1 %v2602_v4  ;;  %v289_v3 = vrot.slane %v280_v62, %v288_v63  ;;  %v297_v4 = vrot.slane %v280_v62, %v296_v0 }
  0xee   :  { %1399 = vmatpush1.bf16.msra.mxu0 %v2597_v5  ;;  %1571 = vmatpush1.bf16.msra.mxu1 %v2600_v6 }
  0xef   :  { %1400 = vmatprep.subr.bf16.mxu0 %v2605_v7  ;;  %1572 = vmatprep.subr.bf16.mxu1 %v2608_v8 }
  0xf2   :  { %1401 = vmatpush1.bf16.msra.mxu0 %v2603_v9  ;;  %1573 = vmatpush1.bf16.msra.mxu1 %v2606_v10 }
  0xf3   :  { %1402 = vmatprep.subr.bf16.mxu0 %v2611_v11  ;;  %1574 = vmatprep.subr.bf16.mxu1 %v2614_v12 }
  0xf6   :  { %1403 = vmatpush1.bf16.msra.mxu0 %v2609_v13  ;;  %1575 = vmatpush1.bf16.msra.mxu1 %v2612_v14 }
  0xf7   :  { %1415 = vmatprep.subr.bf16.mxu0 %v2617_v17  ;;  %1587 = vmatprep.subr.bf16.mxu1 %v2620_v18 }
  0xf9   :  { %1405 = vmatmul.mubr.bf16.vlgmr.msra.gmra.mrb[0].mxu0 %v81_v19  ;;  %1577 = vmatmul.mubr.bf16.vlgmr.msra.gmra.mrb[0].mxu1 %v81_v19 }
  0xfa   :  { %1416 = vmatpush1.bf16.msra.mxu0 %v2615_v20  ;;  %1588 = vmatpush1.bf16.msra.mxu1 %v2618_v21 }
  0xfb   :  { %1447 = vmatprep.mubr.bf16.mxu0 %v2756_v24  ;;  %1619 = vmatprep.mubr.bf16.mxu1 %v2756_v24 }
  0xfc   :  { %2238 = vmatprep.subr.bf16.mxu0 %v2621_v22  ;;  %2260 = vmatprep.subr.bf16.mxu1 %v2622_v23 }
 0x105   :  { %2203 = vmatmul.mubr.msk.bf16.vlgmr.msra.gmra.mrb[0].mxu0 %vm1282_vm0, %v83_v27  ;;  %2204 = vmatmul.mubr.msk.bf16.vlgmr.msra.gmra.mrb[0].mxu1 %vm1282_vm0, %v83_v27 }
 0x106   :  { %2239 = vmatpush3.bf16.msra.mxu0 %v2623_v28  ;;  %2261 = vmatpush3.bf16.msra.mxu1 %v2624_v29 }
 0x107   :  { %2240 = vmatprep.subr.bf16.mxu0 %v2625_v30  ;;  %2262 = vmatprep.subr.bf16.mxu1 %v2626_v31 }
 0x10a   :  { %2241 = vmatpush3.bf16.msra.mxu0 %v2627_v32  ;;  %2263 = vmatpush3.bf16.msra.mxu1 %v2628_v33 }
 0x10b   :  { %2242 = vmatprep.subr.bf16.mxu0 %v2629_v34  ;;  %2264 = vmatprep.subr.bf16.mxu1 %v2630_v35  ;;  %v2205_v35 = vld [vmem:[%s2848_s4] ss:$0 sm:$0xff]  ;;  %s2719_s4 = scalar_lea.vmem %s1995_s11, 256 }
 0x10c   :  { %p2720_p10 = scmp.ne.s32.totalorder %s1995_s11, %s2719_s4  ;;  %p2725_p12 = scmp.lt.s32.totalorder %s2719_s4, %s2719_s4 }
 0x10e   :  { %2243 = vmatpush3.bf16.msra.mxu0 %v2631_v36  ;;  %2265 = vmatpush3.bf16.msra.mxu1 %v2632_v37  ;;  %p2726_p13 = por %p2725_p12, %p2724_p11 }
 0x10f   :  { %2244 = vmatprep.subr.bf16.mxu0 %v2633_v38  ;;  %2266 = vmatprep.subr.bf16.mxu1 %v2634_v39 }
 0x110   :  { %p2727_p0 = pnand %p2726_p13, %p2720_p10 }
 0x112   :  { %2245 = vmatpush3.bf16.msra.mxu0 %v2635_v40  ;;  %2267 = vmatpush3.bf16.msra.mxu1 %v2636_v41 }
 0x113   :  { %2246 = vmatprep.subr.bf16.mxu0 %v2637_v42  ;;  %2268 = vmatprep.subr.bf16.mxu1 %v2638_v43 }
 0x116   :  { %2247 = vmatpush3.bf16.msra.mxu0 %v2639_v44  ;;  %2269 = vmatpush3.bf16.msra.mxu1 %v2640_v45 }
 0x117   :  { %2248 = vmatprep.subr.bf16.mxu0 %v2641_v46  ;;  %2270 = vmatprep.subr.bf16.mxu1 %v2642_v47 }
 0x11a   :  { %2249 = vmatpush3.bf16.msra.mxu0 %v2643_v48  ;;  %2271 = vmatpush3.bf16.msra.mxu1 %v2644_v49 }
 0x11b   :  { %2250 = vmatprep.subr.bf16.mxu0 %v2645_v50  ;;  %2272 = vmatprep.subr.bf16.mxu1 %v2646_v51 }
 0x11e   :  { %2251 = vmatpush3.bf16.msra.mxu0 %v2647_v52  ;;  %2273 = vmatpush3.bf16.msra.mxu1 %v2648_v53 }
 0x11f   :  { %2252 = vmatprep.subr.bf16.mxu0 %v2649_v54  ;;  %2274 = vmatprep.subr.bf16.mxu1 %v2650_v55 }
 0x122   :  { %2253 = vmatpush3.bf16.msra.mxu0 %v2651_v56  ;;  %2275 = vmatpush3.bf16.msra.mxu1 %v2652_v57 }
 0x1d8   :  { %v1449_v5 = vpop.f32.mrb[0].mxu0  ;;  %v1621_v6 = vpop.f32.mrb[0].mxu1 }
 0x1d9   :  { %v2282_v7 = vadd.f32 %v1449_v5, %v285_v1  ;;  %v2286_v8 = vadd.f32 %v1621_v6, %v293_v2  ;;  %v1451_v9 = vpop.f32.mrb[1].mxu0  ;;  %v1623_v10 = vpop.f32.mrb[1].mxu1 }
 0x1da   :  { %v2283_v11 = vadd.f32 %v1451_v9, %v289_v3  ;;  %v2287_v12 = vadd.f32 %v1623_v10, %v297_v4  ;;  %v1453_v13 = vpop.f32.mrb[2].mxu0  ;;  %v1625_v14 = vpop.f32.mrb[2].mxu1 }
 0x1db   :  { %v2284_v15 = vadd.f32 %v1453_v13, %v285_v1  ;;  %v2288_v16 = vadd.f32 %v1625_v14, %v293_v2  ;;  %v1455_v17 = vpop.f32.mrb[3].mxu0  ;;  %v1627_v18 = vpop.f32.mrb[3].mxu1  ;;  %v1630_v21 = vmax.f32 %v2282_v7, 0.0  ;;  %v1632_v22 = vmax.f32 %v2286_v8, 0.0 }
 0x1dc   :  { %v2285_v19 = vadd.f32 %v1455_v17, %v289_v3  ;;  %v2289_v20 = vadd.f32 %v1627_v18, %v297_v4  ;;  %v1631_v25 = vmax.f32 %v2283_v11, 0.0  ;;  %v1633_v26 = vmax.f32 %v2287_v12, 0.0 }
 0x1dd   :  { %v1634_v23 = vmax.f32 %v2284_v15, 0.0  ;;  %v1636_v24 = vmax.f32 %v2288_v16, 0.0 }
 0x1de   :  { %v1635_v27 = vmax.f32 %v2285_v19, 0.0  ;;  %v1637_v28 = vmax.f32 %v2289_v20, 0.0 }
 0x1df   :  { %v1638_v29 = vpack.c.bf16 %v1634_v23, %v1630_v21  ;;  %v1640_v30 = vpack.c.bf16 %v1636_v24, %v1632_v22 }
 0x1e0   :  { %v1639_v31 = vpack.c.bf16 %v1635_v27, %v1631_v25  ;;  %v1641_v32 = vpack.c.bf16 %v1637_v28, %v1633_v26 }
 0x1e2   :  { %1937 = vmatprep.mubr.bf16.mxu0 %v1639_v31  ;;  %1978 = vmatprep.mubr.bf16.mxu1 %v1641_v32 }
 0x1e3   :  { %1938 = vmatmul.mubr.bf16.vlgmr.msra.gmra.mrb[4].mxu0 %v1638_v29  ;;  %1979 = vmatmul.mubr.bf16.vlgmr.msra.gmra.mrb[4].mxu1 %v1640_v30 }
 0x2b6   :  { %v2254_v33 = vpop.f32.mrb[4].mxu0  ;;  %v2276_v34 = vpop.f32.mrb[4].mxu1 }
 0x2b7   :  { %v2255_v36 = vpop.f32.mrb[5].mxu0  ;;  %v2277_v37 = vpop.f32.mrb[5].mxu1 }
 0x2b8   :  { %v2256_v38 = vadd.f32 %v2255_v36, %v2254_v33  ;;  %v2278_v39 = vadd.f32 %v2277_v37, %v2276_v34  ;;  %v2257_v40 = vpop.f32.mrb[6].mxu0  ;;  %v2279_v41 = vpop.f32.mrb[6].mxu1 }
 0x2b9   :  { %v2258_v42 = vpop.f32.mrb[7].mxu0  ;;  %v2280_v43 = vpop.f32.mrb[7].mxu1 }
 0x2ba   :  { %v1940_v44 = vadd.f32 %v2256_v38, %v2205_v35  ;;  %v2259_v45 = vadd.f32 %v2258_v42, %v2257_v40  ;;  %v2281_v46 = vadd.f32 %v2280_v43, %v2279_v41 }
 0x2bc   :  { %v1981_v47 = vadd.f32 %v2278_v39, %v1940_v44  ;;  %v1943_v48 = vadd.f32 %v2259_v45, %v2205_v35 }
 0x2be   :  { %1987 = vst [vmem:[#allocation8] sm:$0xff] %v1981_v47  ;;  %v1984_v49 = vadd.f32 %v2281_v46, %v1943_v48 }
 0x2c0   :  { %1988 = vst [vmem:[#allocation8 + $0x8] sm:$0xff] %v1984_v49 }
 0x2c1   :  { %2730 = shalt.err (!%p2727_p0)
}
 0x2c2   :  { %s2731_s14 = scalar_lea.hbm %s2849_s5, 256 }
 0x2c3   :  { %p2732_p1 = scmp.ne.s32.totalorder %s2849_s5, %s2731_s14  ;;  %p2735_p2 = scmp.lt.u32.totalorder %s2731_s14, %s2849_s5 }
 0x2c5   :  { %p2737_p3 = pnand %p2735_p2, %p2732_p1 }
 0x2c7   :  { %2740 = shalt.err (!%p2737_p3)
}
 0x2c8   :  { %s2758_s18 = smov 128   ;;  %s2759_s19 = smov 8  }
 0x2c9   :  { %2000 = dma.vmem_to_hbm [thread:$0]  %s1995_s11, 256, %s2849_s5, [#allocation4], %s2758_s18, %s2758_s18, %s2759_s19  }
 0x2ca   :  { %2745 = dma.done.wait [#allocation4], 256  }
 0x2cb   :  { %2746 = vsyncadd [#allocation4], 4294967040 }
 0x2cc   :  { %2004 = vsyncpa [#allocation3], 1 }
 0x2cd   :  { %2005 = vsyncpa [#allocation6], 1 }
 0x2ce   :  { %2006 = vsyncpa [#allocation4], 1 }

</bundles_post_ra>
